<compile_context>
chip_gen: v7x
topology: tpu7x:2x2x1
jax: 0.10.0
libtpu: 0.0.40
codegen_flags: <defaults>
</compile_context>

<pallas_src>
import functools

import jax
import jax.numpy as jnp
from jax.experimental import pallas as pl
from jax.experimental.pallas import tpu as pltpu


_VMEM = pl.BlockSpec(memory_space=pltpu.MemorySpace.VMEM)


# ----------------------------------------------------------------------------
# Fused Bottleneck kernel (whole problem fits in VMEM -> single invocation).
# ----------------------------------------------------------------------------

def _bottleneck_kernel(x_ref, w1t_ref, b1_ref, w2s_ref, b2_ref, w3t_ref, b3_ref,
                       o_ref, xcm_ref, y1p_ref, *, h, w):
    # x_ref   : (N, Cin, H*W)          NCHW input, spatial flattened
    # w1t_ref : (width, Cin)           conv1 weight^T, BN1 scale folded in
    # b1_ref  : (width, 1)             BN1 bias
    # w2s_ref : (9, width, width)      conv2 weight per tap [tap, Cout, Cin], BN2 folded
    # b2_ref  : (width, 1)             BN2 bias
    # w3t_ref : (Cout, width)          conv3 weight^T, BN3 scale folded in
    # b3_ref  : (Cout, 1)              BN3 bias
    # o_ref   : (N, Cout, H*W)         output (NCHW, spatial flattened)
    # xcm_ref : (Cin, N*H*W)           VMEM scratch: lane-dense input / identity
    # y1p_ref : (width, N*H*W+2*(w+1)) VMEM scratch: zero-padded conv2 input
    n, cin, hw = x_ref.shape
    m = n * hw
    width = w1t_ref.shape[0]

    # --- NCHW -> (C, M): channels on sublanes, batch*spatial on lanes --------
    for i in range(n):
        xcm_ref[:, i * hw:(i + 1) * hw] = x_ref[i]
    x_cm = xcm_ref[...]                                            # (Cin, M)

    # --- conv1 (1x1) + bn1 + relu  (BN scale pre-folded into w1t) ------------
    y1 = jnp.maximum(
        jnp.dot(w1t_ref[...], x_cm, preferred_element_type=jnp.float32)
        + b1_ref[...], 0.0)                                        # (width, M)

    # --- conv2 (3x3, stride 1, pad 1) + bn2 + relu ----------------------------
    # A (dy, dx) tap is a shift of s = (dy-1)*w + (dx-1) along the flattened M
    # axis.  Realize it as an unaligned lane-window read of a zero-padded VMEM
    # scratch; lanes whose shifted position leaves the row / image are masked.
    pad = w + 1
    y1p_ref[...] = jnp.zeros_like(y1p_ref)
    y1p_ref[:, pad:pad + m] = y1

    lane = jax.lax.broadcasted_iota(jnp.int32, (1, m), 1)
    # h, w are powers of two here, so // and % reduce to cheap bitwise VPU ops.
    ww = lane & (w - 1)                                   # w index per lane
    hh = (lane >> (w.bit_length() - 1)) & (h - 1)         # h index per lane

    acc = jnp.zeros((width, m), jnp.float32)
    t = 0
    for dy in range(3):
        for dx in range(3):
            oy, ox = dy - 1, dx - 1
            s = oy * w + ox
            win = y1p_ref[:, pad + s:pad + s + m]         # y1 shifted by s lanes
            valid = ((hh + oy >= 0) & (hh + oy < h)
                     & (ww + ox >= 0) & (ww + ox < w))
            col = jnp.where(valid, win, 0.0)
            acc = acc + jnp.dot(w2s_ref[t], col,
                                preferred_element_type=jnp.float32)
            t += 1
    y2 = jnp.maximum(acc + b2_ref[...], 0.0)                       # (width, M)

    # --- conv3 (1x1) + bn3 + identity add + relu ------------------------------
    y3 = jnp.maximum(
        jnp.dot(w3t_ref[...], y2, preferred_element_type=jnp.float32)
        + b3_ref[...] + x_cm, 0.0)                                 # (Cout, M)

    # --- (C, M) -> NCHW output -------------------------------------------------
    for i in range(n):
        o_ref[i] = y3[:, i * hw:(i + 1) * hw]


# ----------------------------------------------------------------------------
# Parameter construction + forward wrapper
# ----------------------------------------------------------------------------

def _fold_bn(gamma, beta, mean, var, eps=1e-5):
    scale = gamma / jnp.sqrt(var + eps)
    bias = beta - mean * scale
    return scale.reshape(1, -1), bias.reshape(1, -1)


def make_bottleneck_params(key, inplanes, planes, base_width=64, groups=1):
    expansion = 4
    width = int(planes * (base_width / 64.0)) * groups
    cout = planes * expansion
    ks = jax.random.split(key, 12)

    def conv_w(k, cin, co, kh, kw):
        fan_in = cin * kh * kw
        return (jax.random.normal(k, (kh, kw, cin, co), jnp.float32)
                / jnp.sqrt(fan_in))

    def bn_params(k, c):
        k1, k2, k3, k4 = jax.random.split(k, 4)
        gamma = 1.0 + 0.1 * jax.random.normal(k1, (c,), jnp.float32)
        beta = 0.1 * jax.random.normal(k2, (c,), jnp.float32)
        mean = 0.1 * jax.random.normal(k3, (c,), jnp.float32)
        var = jnp.abs(1.0 + 0.1 * jax.random.normal(k4, (c,), jnp.float32))
        return gamma, beta, mean, var

    params = {
        # conv1: 1x1 (inplanes -> width), stored as (Cin, Cout)
        "w1": conv_w(ks[0], inplanes, width, 1, 1).reshape(inplanes, width),
        "bn1": _fold_bn(*bn_params(ks[1], width)),
        # conv2: 3x3 (width -> width), HWIO
        "w2": conv_w(ks[2], width, width, 3, 3),
        "bn2": _fold_bn(*bn_params(ks[3], width)),
        # conv3: 1x1 (width -> planes*4)
        "w3": conv_w(ks[4], width, cout, 1, 1).reshape(width, cout),
        "bn3": _fold_bn(*bn_params(ks[5], cout)),
    }
    return params, width, cout


@jax.jit
def bottleneck_forward(x_nchw, params):
    """Bottleneck forward. x_nchw: (N, C, H, W) float32, C == planes*4."""
    x = x_nchw.astype(jnp.float32)
    n, cin, h, w = x.shape
    hw = h * w
    m = n * hw
    assert h & (h - 1) == 0 and w & (w - 1) == 0, (
        "TODO(synk): non power-of-two spatial dims need div/mod index math")

    s1, b1 = params["bn1"]
    s2, b2 = params["bn2"]
    s3, b3 = params["bn3"]
    width = params["w1"].shape[1]
    cout = params["w3"].shape[1]
    assert cin == cout  # downsample=None -> identity add requires this

    # Fold eval-mode BN scale into conv weights; transpose for the (Cout, M)
    # in-kernel layout.  (Tiny one-off XLA ops on a few KB of weights.)
    w1t = (params["w1"] * s1).T                                    # (width, cin)
    w2s = (params["w2"] * s2[0]).reshape(9, width, width).transpose(0, 2, 1)
    w3t = (params["w3"] * s3).T                                    # (cout, width)
    b1c = b1.reshape(width, 1)
    b2c = b2.reshape(width, 1)
    b3c = b3.reshape(cout, 1)

    x3 = x.reshape(n, cin, hw)   # metadata-only reshape, no transpose / HBM pass

    out3 = pl.pallas_call(
        functools.partial(_bottleneck_kernel, h=h, w=w),
        out_shape=jax.ShapeDtypeStruct((n, cout, hw), jnp.float32),
        in_specs=[_VMEM] * 7,
        out_specs=_VMEM,
        scratch_shapes=[
            pltpu.VMEM((cin, m), jnp.float32),                  # identity / x_cm
            pltpu.VMEM((width, m + 2 * (w + 1)), jnp.float32),  # padded conv2 in
        ],
    )(x3, w1t, b1c, w2s, b2c, w3t, b3c)

    return out3.reshape(n, cout, h, w)


# ----------------------------------------------------------------------------
# Pure-JAX reference (same math, f32-exact) for the self-check
# ----------------------------------------------------------------------------

def bottleneck_reference(x_nchw, params):
    x = jnp.transpose(x_nchw, (0, 2, 3, 1)).astype(jnp.float32)
    s1, b1 = params["bn1"]
    s2, b2 = params["bn2"]
    s3, b3 = params["bn3"]
    hp = jax.lax.Precision.HIGHEST
    dn = ("NHWC", "HWIO", "NHWC")

    o = jnp.einsum("nhwc,cd->nhwd", x, params["w1"], precision=hp)
    o = jnp.maximum(o * s1[0] + b1[0], 0.0)
    o = jax.lax.conv_general_dilated(o, params["w2"], (1, 1), "SAME",
                                     dimension_numbers=dn, precision=hp)
    o = jnp.maximum(o * s2[0] + b2[0], 0.0)
    o = jnp.einsum("nhwc,cd->nhwd", o, params["w3"], precision=hp)
    o = jnp.maximum(o * s3[0] + b3[0] + x, 0.0)
    return jnp.transpose(o, (0, 3, 1, 2))


if __name__ == "__main__":
    key = jax.random.PRNGKey(0)
    k_x, k_p = jax.random.split(key)

    N, PLANES = 2, 4
    INPLANES = PLANES * 4          # 16, so the identity add is valid
    H = W = 8                      # N*H*W = 128 -> exactly one full lane axis

    params, width, cout = make_bottleneck_params(k_p, INPLANES, PLANES)
    x = jax.random.normal(k_x, (N, INPLANES, H, W), jnp.float32)

    out = jax.block_until_ready(bottleneck_forward(x, params))
    ref = bottleneck_reference(x, params)

    assert out.shape == (N, INPLANES, H, W), out.shape
    assert jnp.allclose(out, ref, rtol=5e-3, atol=5e-3), (
        float(jnp.max(jnp.abs(out - ref))))

    print("KERNEL_OK")
</pallas_src>

<mosaic_0001>
module attributes {stable_mosaic.version = 11 : i64} {
  func.func @_bottleneck_kernel(%arg0: memref<2x16x64xf32, #tpu.memory_space<vmem>>, %arg1: memref<4x16xf32, #tpu.memory_space<vmem>>, %arg2: memref<4x1xf32, #tpu.memory_space<vmem>>, %arg3: memref<9x4x4xf32, #tpu.memory_space<vmem>>, %arg4: memref<4x1xf32, #tpu.memory_space<vmem>>, %arg5: memref<16x4xf32, #tpu.memory_space<vmem>>, %arg6: memref<16x1xf32, #tpu.memory_space<vmem>>, %arg7: memref<2x16x64xf32, #tpu.memory_space<vmem>>, %arg8: memref<16x128xf32, #tpu.memory_space<vmem>>, %arg9: memref<4x146xf32, #tpu.memory_space<vmem>>) attributes {dimension_semantics = [], scalar_prefetch = 0 : i64, scratch_operands = 2 : i64, tpu.core_type = #tpu.core_type<tc>} {
    %c0 = arith.constant 0 : index
    %c0_0 = arith.constant 0 : index
    %c0_1 = arith.constant 0 : index
    %0 = vector.load %arg0[%c0, %c0_0, %c0_1] : memref<2x16x64xf32, #tpu.memory_space<vmem>>, vector<1x16x64xf32>
    %1 = vector.shape_cast %0 : vector<1x16x64xf32> to vector<16x64xf32>
    %c0_2 = arith.constant 0 : index
    %c0_3 = arith.constant 0 : index
    %2 = vector.load %arg8[%c0_2, %c0_3] : memref<16x128xf32, #tpu.memory_space<vmem>>, vector<16x64xf32>
    tpu.vector_store %arg8[%c0_2, %c0_3], %1 {strides = array<i32>} : memref<16x128xf32, #tpu.memory_space<vmem>>, vector<16x64xf32>,
    %c1 = arith.constant 1 : index
    %c0_4 = arith.constant 0 : index
    %c0_5 = arith.constant 0 : index
    %3 = vector.load %arg0[%c1, %c0_4, %c0_5] : memref<2x16x64xf32, #tpu.memory_space<vmem>>, vector<1x16x64xf32>
    %4 = vector.shape_cast %3 : vector<1x16x64xf32> to vector<16x64xf32>
    %c0_6 = arith.constant 0 : index
    %c64 = arith.constant 64 : index
    %5 = vector.load %arg8[%c0_6, %c64] : memref<16x128xf32, #tpu.memory_space<vmem>>, vector<16x64xf32>
    tpu.vector_store %arg8[%c0_6, %c64], %4 {strides = array<i32>} : memref<16x128xf32, #tpu.memory_space<vmem>>, vector<16x64xf32>,
    %c0_7 = arith.constant 0 : index
    %c0_8 = arith.constant 0 : index
    %6 = vector.load %arg8[%c0_7, %c0_8] : memref<16x128xf32, #tpu.memory_space<vmem>>, vector<16x128xf32>
    %c0_9 = arith.constant 0 : index
    %c0_10 = arith.constant 0 : index
    %7 = vector.load %arg1[%c0_9, %c0_10] : memref<4x16xf32, #tpu.memory_space<vmem>>, vector<4x16xf32>
    %cst = arith.constant dense<0.000000e+00> : vector<4x128xf32>
    %8 = tpu.matmul %7, %6, %cst {dimension_numbers = #tpu.dot_dimension_numbers<[1], [0], [0], [1], [0, 0, 1, 1], [], []>} : vector<4x16xf32>, vector<16x128xf32>, vector<4x128xf32> -> vector<4x128xf32>
    %c0_11 = arith.constant 0 : index
    %c0_12 = arith.constant 0 : index
    %9 = vector.load %arg2[%c0_11, %c0_12] : memref<4x1xf32, #tpu.memory_space<vmem>>, vector<4x1xf32>
    %10 = vector.broadcast %9 : vector<4x1xf32> to vector<4x128xf32>
    %11 = arith.addf %8, %10 : vector<4x128xf32>
    %cst_13 = arith.constant 0.000000e+00 : f32
    %12 = vector.broadcast %cst_13 : f32 to vector<4x128xf32>
    %13 = arith.maximumf %11, %12 : vector<4x128xf32>
    %cst_14 = arith.constant 0.000000e+00 : f32
    %14 = vector.broadcast %cst_14 : f32 to vector<4x146xf32>
    %c0_15 = arith.constant 0 : index
    %c0_16 = arith.constant 0 : index
    %15 = vector.load %arg9[%c0_15, %c0_16] : memref<4x146xf32, #tpu.memory_space<vmem>>, vector<4x146xf32>
    tpu.vector_store %arg9[%c0_15, %c0_16], %14 {strides = array<i32>} : memref<4x146xf32, #tpu.memory_space<vmem>>, vector<4x146xf32>,
    %c0_17 = arith.constant 0 : index
    %c9 = arith.constant 9 : index
    %16 = vector.load %arg9[%c0_17, %c9] : memref<4x146xf32, #tpu.memory_space<vmem>>, vector<4x128xf32>
    tpu.vector_store %arg9[%c0_17, %c9], %13 {strides = array<i32>} : memref<4x146xf32, #tpu.memory_space<vmem>>, vector<4x128xf32>,
    %17 = tpu.iota {dimensions = array<i32: 1>} : vector<1x128xi32>
    %c7_i32 = arith.constant 7 : i32
    %18 = vector.broadcast %c7_i32 : i32 to vector<1x128xi32>
    %19 = arith.andi %17, %18 : vector<1x128xi32>
    %c3_i32 = arith.constant 3 : i32
    %20 = vector.broadcast %c3_i32 : i32 to vector<1x128xi32>
    %21 = arith.shrsi %17, %20 : vector<1x128xi32>
    %c7_i32_18 = arith.constant 7 : i32
    %22 = vector.broadcast %c7_i32_18 : i32 to vector<1x128xi32>
    %23 = arith.andi %21, %22 : vector<1x128xi32>
    %cst_19 = arith.constant 0.000000e+00 : f32
    %24 = vector.broadcast %cst_19 : f32 to vector<4x128xf32>
    %c0_20 = arith.constant 0 : index
    %c0_21 = arith.constant 0 : index
    %25 = vector.load %arg9[%c0_20, %c0_21] : memref<4x146xf32, #tpu.memory_space<vmem>>, vector<4x128xf32>
    %c-1_i32 = arith.constant -1 : i32
    %26 = vector.broadcast %c-1_i32 : i32 to vector<1x128xi32>
    %27 = arith.addi %23, %26 : vector<1x128xi32>
    %c0_i32 = arith.constant 0 : i32
    %28 = vector.broadcast %c0_i32 : i32 to vector<1x128xi32>
    %29 = arith.cmpi sge, %27, %28 : vector<1x128xi32>
    %c-1_i32_22 = arith.constant -1 : i32
    %30 = vector.broadcast %c-1_i32_22 : i32 to vector<1x128xi32>
    %31 = arith.addi %23, %30 : vector<1x128xi32>
    %c8_i32 = arith.constant 8 : i32
    %32 = vector.broadcast %c8_i32 : i32 to vector<1x128xi32>
    %33 = arith.cmpi slt, %31, %32 : vector<1x128xi32>
    %34 = arith.andi %29, %33 : vector<1x128xi1>
    %c-1_i32_23 = arith.constant -1 : i32
    %35 = vector.broadcast %c-1_i32_23 : i32 to vector<1x128xi32>
    %36 = arith.addi %19, %35 : vector<1x128xi32>
    %c0_i32_24 = arith.constant 0 : i32
    %37 = vector.broadcast %c0_i32_24 : i32 to vector<1x128xi32>
    %38 = arith.cmpi sge, %36, %37 : vector<1x128xi32>
    %39 = arith.andi %34, %38 : vector<1x128xi1>
    %c-1_i32_25 = arith.constant -1 : i32
    %40 = vector.broadcast %c-1_i32_25 : i32 to vector<1x128xi32>
    %41 = arith.addi %19, %40 : vector<1x128xi32>
    %c8_i32_26 = arith.constant 8 : i32
    %42 = vector.broadcast %c8_i32_26 : i32 to vector<1x128xi32>
    %43 = arith.cmpi slt, %41, %42 : vector<1x128xi32>
    %44 = arith.andi %39, %43 : vector<1x128xi1>
    %cst_27 = arith.constant 0.000000e+00 : f32
    %45 = vector.shape_cast %44 : vector<1x128xi1> to vector<1x128xi1>
    %46 = vector.broadcast %45 : vector<1x128xi1> to vector<4x128xi1>
    %47 = vector.broadcast %cst_27 : f32 to vector<4x128xf32>
    %48 = arith.select %46, %25, %47 : vector<4x128xi1>, vector<4x128xf32>
    %c0_28 = arith.constant 0 : index
    %c0_29 = arith.constant 0 : index
    %c0_30 = arith.constant 0 : index
    %49 = vector.load %arg3[%c0_28, %c0_29, %c0_30] : memref<9x4x4xf32, #tpu.memory_space<vmem>>, vector<1x4x4xf32>
    %50 = vector.shape_cast %49 : vector<1x4x4xf32> to vector<4x4xf32>
    %cst_31 = arith.constant dense<0.000000e+00> : vector<4x128xf32>
    %51 = tpu.matmul %50, %48, %cst_31 {dimension_numbers = #tpu.dot_dimension_numbers<[1], [0], [0], [1], [0, 0, 1, 1], [], []>} : vector<4x4xf32>, vector<4x128xf32>, vector<4x128xf32> -> vector<4x128xf32>
    %52 = arith.addf %24, %51 : vector<4x128xf32>
    %c0_32 = arith.constant 0 : index
    %c1_33 = arith.constant 1 : index
    %53 = vector.load %arg9[%c0_32, %c1_33] : memref<4x146xf32, #tpu.memory_space<vmem>>, vector<4x128xf32>
    %c-1_i32_34 = arith.constant -1 : i32
    %54 = vector.broadcast %c-1_i32_34 : i32 to vector<1x128xi32>
    %55 = arith.addi %23, %54 : vector<1x128xi32>
    %c0_i32_35 = arith.constant 0 : i32
    %56 = vector.broadcast %c0_i32_35 : i32 to vector<1x128xi32>
    %57 = arith.cmpi sge, %55, %56 : vector<1x128xi32>
    %c-1_i32_36 = arith.constant -1 : i32
    %58 = vector.broadcast %c-1_i32_36 : i32 to vector<1x128xi32>
    %59 = arith.addi %23, %58 : vector<1x128xi32>
    %c8_i32_37 = arith.constant 8 : i32
    %60 = vector.broadcast %c8_i32_37 : i32 to vector<1x128xi32>
    %61 = arith.cmpi slt, %59, %60 : vector<1x128xi32>
    %62 = arith.andi %57, %61 : vector<1x128xi1>
    %c0_i32_38 = arith.constant 0 : i32
    %63 = vector.broadcast %c0_i32_38 : i32 to vector<1x128xi32>
    %64 = arith.addi %19, %63 : vector<1x128xi32>
    %c0_i32_39 = arith.constant 0 : i32
    %65 = vector.broadcast %c0_i32_39 : i32 to vector<1x128xi32>
    %66 = arith.cmpi sge, %64, %65 : vector<1x128xi32>
    %67 = arith.andi %62, %66 : vector<1x128xi1>
    %c0_i32_40 = arith.constant 0 : i32
    %68 = vector.broadcast %c0_i32_40 : i32 to vector<1x128xi32>
    %69 = arith.addi %19, %68 : vector<1x128xi32>
    %c8_i32_41 = arith.constant 8 : i32
    %70 = vector.broadcast %c8_i32_41 : i32 to vector<1x128xi32>
    %71 = arith.cmpi slt, %69, %70 : vector<1x128xi32>
    %72 = arith.andi %67, %71 : vector<1x128xi1>
    %cst_42 = arith.constant 0.000000e+00 : f32
    %73 = vector.shape_cast %72 : vector<1x128xi1> to vector<1x128xi1>
    %74 = vector.broadcast %73 : vector<1x128xi1> to vector<4x128xi1>
    %75 = vector.broadcast %cst_42 : f32 to vector<4x128xf32>
    %76 = arith.select %74, %53, %75 : vector<4x128xi1>, vector<4x128xf32>
    %c1_43 = arith.constant 1 : index
    %c0_44 = arith.constant 0 : index
    %c0_45 = arith.constant 0 : index
    %77 = vector.load %arg3[%c1_43, %c0_44, %c0_45] : memref<9x4x4xf32, #tpu.memory_space<vmem>>, vector<1x4x4xf32>
    %78 = vector.shape_cast %77 : vector<1x4x4xf32> to vector<4x4xf32>
    %cst_46 = arith.constant dense<0.000000e+00> : vector<4x128xf32>
    %79 = tpu.matmul %78, %76, %cst_46 {dimension_numbers = #tpu.dot_dimension_numbers<[1], [0], [0], [1], [0, 0, 1, 1], [], []>} : vector<4x4xf32>, vector<4x128xf32>, vector<4x128xf32> -> vector<4x128xf32>
    %80 = arith.addf %52, %79 : vector<4x128xf32>
    %c0_47 = arith.constant 0 : index
    %c2 = arith.constant 2 : index
    %81 = vector.load %arg9[%c0_47, %c2] : memref<4x146xf32, #tpu.memory_space<vmem>>, vector<4x128xf32>
    %c-1_i32_48 = arith.constant -1 : i32
    %82 = vector.broadcast %c-1_i32_48 : i32 to vector<1x128xi32>
    %83 = arith.addi %23, %82 : vector<1x128xi32>
    %c0_i32_49 = arith.constant 0 : i32
    %84 = vector.broadcast %c0_i32_49 : i32 to vector<1x128xi32>
    %85 = arith.cmpi sge, %83, %84 : vector<1x128xi32>
    %c-1_i32_50 = arith.constant -1 : i32
    %86 = vector.broadcast %c-1_i32_50 : i32 to vector<1x128xi32>
    %87 = arith.addi %23, %86 : vector<1x128xi32>
    %c8_i32_51 = arith.constant 8 : i32
    %88 = vector.broadcast %c8_i32_51 : i32 to vector<1x128xi32>
    %89 = arith.cmpi slt, %87, %88 : vector<1x128xi32>
    %90 = arith.andi %85, %89 : vector<1x128xi1>
    %c1_i32 = arith.constant 1 : i32
    %91 = vector.broadcast %c1_i32 : i32 to vector<1x128xi32>
    %92 = arith.addi %19, %91 : vector<1x128xi32>
    %c0_i32_52 = arith.constant 0 : i32
    %93 = vector.broadcast %c0_i32_52 : i32 to vector<1x128xi32>
    %94 = arith.cmpi sge, %92, %93 : vector<1x128xi32>
    %95 = arith.andi %90, %94 : vector<1x128xi1>
    %c1_i32_53 = arith.constant 1 : i32
    %96 = vector.broadcast %c1_i32_53 : i32 to vector<1x128xi32>
    %97 = arith.addi %19, %96 : vector<1x128xi32>
    %c8_i32_54 = arith.constant 8 : i32
    %98 = vector.broadcast %c8_i32_54 : i32 to vector<1x128xi32>
    %99 = arith.cmpi slt, %97, %98 : vector<1x128xi32>
    %100 = arith.andi %95, %99 : vector<1x128xi1>
    %cst_55 = arith.constant 0.000000e+00 : f32
    %101 = vector.shape_cast %100 : vector<1x128xi1> to vector<1x128xi1>
    %102 = vector.broadcast %101 : vector<1x128xi1> to vector<4x128xi1>
    %103 = vector.broadcast %cst_55 : f32 to vector<4x128xf32>
    %104 = arith.select %102, %81, %103 : vector<4x128xi1>, vector<4x128xf32>
    %c2_56 = arith.constant 2 : index
    %c0_57 = arith.constant 0 : index
    %c0_58 = arith.constant 0 : index
    %105 = vector.load %arg3[%c2_56, %c0_57, %c0_58] : memref<9x4x4xf32, #tpu.memory_space<vmem>>, vector<1x4x4xf32>
    %106 = vector.shape_cast %105 : vector<1x4x4xf32> to vector<4x4xf32>
    %cst_59 = arith.constant dense<0.000000e+00> : vector<4x128xf32>
    %107 = tpu.matmul %106, %104, %cst_59 {dimension_numbers = #tpu.dot_dimension_numbers<[1], [0], [0], [1], [0, 0, 1, 1], [], []>} : vector<4x4xf32>, vector<4x128xf32>, vector<4x128xf32> -> vector<4x128xf32>
    %108 = arith.addf %80, %107 : vector<4x128xf32>
    %c0_60 = arith.constant 0 : index
    %c8 = arith.constant 8 : index
    %109 = vector.load %arg9[%c0_60, %c8] : memref<4x146xf32, #tpu.memory_space<vmem>>, vector<4x128xf32>
    %c0_i32_61 = arith.constant 0 : i32
    %110 = vector.broadcast %c0_i32_61 : i32 to vector<1x128xi32>
    %111 = arith.addi %23, %110 : vector<1x128xi32>
    %c0_i32_62 = arith.constant 0 : i32
    %112 = vector.broadcast %c0_i32_62 : i32 to vector<1x128xi32>
    %113 = arith.cmpi sge, %111, %112 : vector<1x128xi32>
    %c0_i32_63 = arith.constant 0 : i32
    %114 = vector.broadcast %c0_i32_63 : i32 to vector<1x128xi32>
    %115 = arith.addi %23, %114 : vector<1x128xi32>
    %c8_i32_64 = arith.constant 8 : i32
    %116 = vector.broadcast %c8_i32_64 : i32 to vector<1x128xi32>
    %117 = arith.cmpi slt, %115, %116 : vector<1x128xi32>
    %118 = arith.andi %113, %117 : vector<1x128xi1>
    %c-1_i32_65 = arith.constant -1 : i32
    %119 = vector.broadcast %c-1_i32_65 : i32 to vector<1x128xi32>
    %120 = arith.addi %19, %119 : vector<1x128xi32>
    %c0_i32_66 = arith.constant 0 : i32
    %121 = vector.broadcast %c0_i32_66 : i32 to vector<1x128xi32>
    %122 = arith.cmpi sge, %120, %121 : vector<1x128xi32>
    %123 = arith.andi %118, %122 : vector<1x128xi1>
    %c-1_i32_67 = arith.constant -1 : i32
    %124 = vector.broadcast %c-1_i32_67 : i32 to vector<1x128xi32>
    %125 = arith.addi %19, %124 : vector<1x128xi32>
    %c8_i32_68 = arith.constant 8 : i32
    %126 = vector.broadcast %c8_i32_68 : i32 to vector<1x128xi32>
    %127 = arith.cmpi slt, %125, %126 : vector<1x128xi32>
    %128 = arith.andi %123, %127 : vector<1x128xi1>
    %cst_69 = arith.constant 0.000000e+00 : f32
    %129 = vector.shape_cast %128 : vector<1x128xi1> to vector<1x128xi1>
    %130 = vector.broadcast %129 : vector<1x128xi1> to vector<4x128xi1>
    %131 = vector.broadcast %cst_69 : f32 to vector<4x128xf32>
    %132 = arith.select %130, %109, %131 : vector<4x128xi1>, vector<4x128xf32>
    %c3 = arith.constant 3 : index
    %c0_70 = arith.constant 0 : index
    %c0_71 = arith.constant 0 : index
    %133 = vector.load %arg3[%c3, %c0_70, %c0_71] : memref<9x4x4xf32, #tpu.memory_space<vmem>>, vector<1x4x4xf32>
    %134 = vector.shape_cast %133 : vector<1x4x4xf32> to vector<4x4xf32>
    %cst_72 = arith.constant dense<0.000000e+00> : vector<4x128xf32>
    %135 = tpu.matmul %134, %132, %cst_72 {dimension_numbers = #tpu.dot_dimension_numbers<[1], [0], [0], [1], [0, 0, 1, 1], [], []>} : vector<4x4xf32>, vector<4x128xf32>, vector<4x128xf32> -> vector<4x128xf32>
    %136 = arith.addf %108, %135 : vector<4x128xf32>
    %c0_73 = arith.constant 0 : index
    %c9_74 = arith.constant 9 : index
    %137 = vector.load %arg9[%c0_73, %c9_74] : memref<4x146xf32, #tpu.memory_space<vmem>>, vector<4x128xf32>
    %c0_i32_75 = arith.constant 0 : i32
    %138 = vector.broadcast %c0_i32_75 : i32 to vector<1x128xi32>
    %139 = arith.addi %23, %138 : vector<1x128xi32>
    %c0_i32_76 = arith.constant 0 : i32
    %140 = vector.broadcast %c0_i32_76 : i32 to vector<1x128xi32>
    %141 = arith.cmpi sge, %139, %140 : vector<1x128xi32>
    %c0_i32_77 = arith.constant 0 : i32
    %142 = vector.broadcast %c0_i32_77 : i32 to vector<1x128xi32>
    %143 = arith.addi %23, %142 : vector<1x128xi32>
    %c8_i32_78 = arith.constant 8 : i32
    %144 = vector.broadcast %c8_i32_78 : i32 to vector<1x128xi32>
    %145 = arith.cmpi slt, %143, %144 : vector<1x128xi32>
    %146 = arith.andi %141, %145 : vector<1x128xi1>
    %c0_i32_79 = arith.constant 0 : i32
    %147 = vector.broadcast %c0_i32_79 : i32 to vector<1x128xi32>
    %148 = arith.addi %19, %147 : vector<1x128xi32>
    %c0_i32_80 = arith.constant 0 : i32
    %149 = vector.broadcast %c0_i32_80 : i32 to vector<1x128xi32>
    %150 = arith.cmpi sge, %148, %149 : vector<1x128xi32>
    %151 = arith.andi %146, %150 : vector<1x128xi1>
    %c0_i32_81 = arith.constant 0 : i32
    %152 = vector.broadcast %c0_i32_81 : i32 to vector<1x128xi32>
    %153 = arith.addi %19, %152 : vector<1x128xi32>
    %c8_i32_82 = arith.constant 8 : i32
    %154 = vector.broadcast %c8_i32_82 : i32 to vector<1x128xi32>
    %155 = arith.cmpi slt, %153, %154 : vector<1x128xi32>
    %156 = arith.andi %151, %155 : vector<1x128xi1>
    %cst_83 = arith.constant 0.000000e+00 : f32
    %157 = vector.shape_cast %156 : vector<1x128xi1> to vector<1x128xi1>
    %158 = vector.broadcast %157 : vector<1x128xi1> to vector<4x128xi1>
    %159 = vector.broadcast %cst_83 : f32 to vector<4x128xf32>
    %160 = arith.select %158, %137, %159 : vector<4x128xi1>, vector<4x128xf32>
    %c4 = arith.constant 4 : index
    %c0_84 = arith.constant 0 : index
    %c0_85 = arith.constant 0 : index
    %161 = vector.load %arg3[%c4, %c0_84, %c0_85] : memref<9x4x4xf32, #tpu.memory_space<vmem>>, vector<1x4x4xf32>
    %162 = vector.shape_cast %161 : vector<1x4x4xf32> to vector<4x4xf32>
    %cst_86 = arith.constant dense<0.000000e+00> : vector<4x128xf32>
    %163 = tpu.matmul %162, %160, %cst_86 {dimension_numbers = #tpu.dot_dimension_numbers<[1], [0], [0], [1], [0, 0, 1, 1], [], []>} : vector<4x4xf32>, vector<4x128xf32>, vector<4x128xf32> -> vector<4x128xf32>
    %164 = arith.addf %136, %163 : vector<4x128xf32>
    %c0_87 = arith.constant 0 : index
    %c10 = arith.constant 10 : index
    %165 = vector.load %arg9[%c0_87, %c10] : memref<4x146xf32, #tpu.memory_space<vmem>>, vector<4x128xf32>
    %c0_i32_88 = arith.constant 0 : i32
    %166 = vector.broadcast %c0_i32_88 : i32 to vector<1x128xi32>
    %167 = arith.addi %23, %166 : vector<1x128xi32>
    %c0_i32_89 = arith.constant 0 : i32
    %168 = vector.broadcast %c0_i32_89 : i32 to vector<1x128xi32>
    %169 = arith.cmpi sge, %167, %168 : vector<1x128xi32>
    %c0_i32_90 = arith.constant 0 : i32
    %170 = vector.broadcast %c0_i32_90 : i32 to vector<1x128xi32>
    %171 = arith.addi %23, %170 : vector<1x128xi32>
    %c8_i32_91 = arith.constant 8 : i32
    %172 = vector.broadcast %c8_i32_91 : i32 to vector<1x128xi32>
    %173 = arith.cmpi slt, %171, %172 : vector<1x128xi32>
    %174 = arith.andi %169, %173 : vector<1x128xi1>
    %c1_i32_92 = arith.constant 1 : i32
    %175 = vector.broadcast %c1_i32_92 : i32 to vector<1x128xi32>
    %176 = arith.addi %19, %175 : vector<1x128xi32>
    %c0_i32_93 = arith.constant 0 : i32
    %177 = vector.broadcast %c0_i32_93 : i32 to vector<1x128xi32>
    %178 = arith.cmpi sge, %176, %177 : vector<1x128xi32>
    %179 = arith.andi %174, %178 : vector<1x128xi1>
    %c1_i32_94 = arith.constant 1 : i32
    %180 = vector.broadcast %c1_i32_94 : i32 to vector<1x128xi32>
    %181 = arith.addi %19, %180 : vector<1x128xi32>
    %c8_i32_95 = arith.constant 8 : i32
    %182 = vector.broadcast %c8_i32_95 : i32 to vector<1x128xi32>
    %183 = arith.cmpi slt, %181, %182 : vector<1x128xi32>
    %184 = arith.andi %179, %183 : vector<1x128xi1>
    %cst_96 = arith.constant 0.000000e+00 : f32
    %185 = vector.shape_cast %184 : vector<1x128xi1> to vector<1x128xi1>
    %186 = vector.broadcast %185 : vector<1x128xi1> to vector<4x128xi1>
    %187 = vector.broadcast %cst_96 : f32 to vector<4x128xf32>
    %188 = arith.select %186, %165, %187 : vector<4x128xi1>, vector<4x128xf32>
    %c5 = arith.constant 5 : index
    %c0_97 = arith.constant 0 : index
    %c0_98 = arith.constant 0 : index
    %189 = vector.load %arg3[%c5, %c0_97, %c0_98] : memref<9x4x4xf32, #tpu.memory_space<vmem>>, vector<1x4x4xf32>
    %190 = vector.shape_cast %189 : vector<1x4x4xf32> to vector<4x4xf32>
    %cst_99 = arith.constant dense<0.000000e+00> : vector<4x128xf32>
    %191 = tpu.matmul %190, %188, %cst_99 {dimension_numbers = #tpu.dot_dimension_numbers<[1], [0], [0], [1], [0, 0, 1, 1], [], []>} : vector<4x4xf32>, vector<4x128xf32>, vector<4x128xf32> -> vector<4x128xf32>
    %192 = arith.addf %164, %191 : vector<4x128xf32>
    %c0_100 = arith.constant 0 : index
    %c16 = arith.constant 16 : index
    %193 = vector.load %arg9[%c0_100, %c16] : memref<4x146xf32, #tpu.memory_space<vmem>>, vector<4x128xf32>
    %c1_i32_101 = arith.constant 1 : i32
    %194 = vector.broadcast %c1_i32_101 : i32 to vector<1x128xi32>
    %195 = arith.addi %23, %194 : vector<1x128xi32>
    %c0_i32_102 = arith.constant 0 : i32
    %196 = vector.broadcast %c0_i32_102 : i32 to vector<1x128xi32>
    %197 = arith.cmpi sge, %195, %196 : vector<1x128xi32>
    %c1_i32_103 = arith.constant 1 : i32
    %198 = vector.broadcast %c1_i32_103 : i32 to vector<1x128xi32>
    %199 = arith.addi %23, %198 : vector<1x128xi32>
    %c8_i32_104 = arith.constant 8 : i32
    %200 = vector.broadcast %c8_i32_104 : i32 to vector<1x128xi32>
    %201 = arith.cmpi slt, %199, %200 : vector<1x128xi32>
    %202 = arith.andi %197, %201 : vector<1x128xi1>
    %c-1_i32_105 = arith.constant -1 : i32
    %203 = vector.broadcast %c-1_i32_105 : i32 to vector<1x128xi32>
    %204 = arith.addi %19, %203 : vector<1x128xi32>
    %c0_i32_106 = arith.constant 0 : i32
    %205 = vector.broadcast %c0_i32_106 : i32 to vector<1x128xi32>
    %206 = arith.cmpi sge, %204, %205 : vector<1x128xi32>
    %207 = arith.andi %202, %206 : vector<1x128xi1>
    %c-1_i32_107 = arith.constant -1 : i32
    %208 = vector.broadcast %c-1_i32_107 : i32 to vector<1x128xi32>
    %209 = arith.addi %19, %208 : vector<1x128xi32>
    %c8_i32_108 = arith.constant 8 : i32
    %210 = vector.broadcast %c8_i32_108 : i32 to vector<1x128xi32>
    %211 = arith.cmpi slt, %209, %210 : vector<1x128xi32>
    %212 = arith.andi %207, %211 : vector<1x128xi1>
    %cst_109 = arith.constant 0.000000e+00 : f32
    %213 = vector.shape_cast %212 : vector<1x128xi1> to vector<1x128xi1>
    %214 = vector.broadcast %213 : vector<1x128xi1> to vector<4x128xi1>
    %215 = vector.broadcast %cst_109 : f32 to vector<4x128xf32>
    %216 = arith.select %214, %193, %215 : vector<4x128xi1>, vector<4x128xf32>
    %c6 = arith.constant 6 : index
    %c0_110 = arith.constant 0 : index
    %c0_111 = arith.constant 0 : index
    %217 = vector.load %arg3[%c6, %c0_110, %c0_111] : memref<9x4x4xf32, #tpu.memory_space<vmem>>, vector<1x4x4xf32>
    %218 = vector.shape_cast %217 : vector<1x4x4xf32> to vector<4x4xf32>
    %cst_112 = arith.constant dense<0.000000e+00> : vector<4x128xf32>
    %219 = tpu.matmul %218, %216, %cst_112 {dimension_numbers = #tpu.dot_dimension_numbers<[1], [0], [0], [1], [0, 0, 1, 1], [], []>} : vector<4x4xf32>, vector<4x128xf32>, vector<4x128xf32> -> vector<4x128xf32>
    %220 = arith.addf %192, %219 : vector<4x128xf32>
    %c0_113 = arith.constant 0 : index
    %c17 = arith.constant 17 : index
    %221 = vector.load %arg9[%c0_113, %c17] : memref<4x146xf32, #tpu.memory_space<vmem>>, vector<4x128xf32>
    %c1_i32_114 = arith.constant 1 : i32
    %222 = vector.broadcast %c1_i32_114 : i32 to vector<1x128xi32>
    %223 = arith.addi %23, %222 : vector<1x128xi32>
    %c0_i32_115 = arith.constant 0 : i32
    %224 = vector.broadcast %c0_i32_115 : i32 to vector<1x128xi32>
    %225 = arith.cmpi sge, %223, %224 : vector<1x128xi32>
    %c1_i32_116 = arith.constant 1 : i32
    %226 = vector.broadcast %c1_i32_116 : i32 to vector<1x128xi32>
    %227 = arith.addi %23, %226 : vector<1x128xi32>
    %c8_i32_117 = arith.constant 8 : i32
    %228 = vector.broadcast %c8_i32_117 : i32 to vector<1x128xi32>
    %229 = arith.cmpi slt, %227, %228 : vector<1x128xi32>
    %230 = arith.andi %225, %229 : vector<1x128xi1>
    %c0_i32_118 = arith.constant 0 : i32
    %231 = vector.broadcast %c0_i32_118 : i32 to vector<1x128xi32>
    %232 = arith.addi %19, %231 : vector<1x128xi32>
    %c0_i32_119 = arith.constant 0 : i32
    %233 = vector.broadcast %c0_i32_119 : i32 to vector<1x128xi32>
    %234 = arith.cmpi sge, %232, %233 : vector<1x128xi32>
    %235 = arith.andi %230, %234 : vector<1x128xi1>
    %c0_i32_120 = arith.constant 0 : i32
    %236 = vector.broadcast %c0_i32_120 : i32 to vector<1x128xi32>
    %237 = arith.addi %19, %236 : vector<1x128xi32>
    %c8_i32_121 = arith.constant 8 : i32
    %238 = vector.broadcast %c8_i32_121 : i32 to vector<1x128xi32>
    %239 = arith.cmpi slt, %237, %238 : vector<1x128xi32>
    %240 = arith.andi %235, %239 : vector<1x128xi1>
    %cst_122 = arith.constant 0.000000e+00 : f32
    %241 = vector.shape_cast %240 : vector<1x128xi1> to vector<1x128xi1>
    %242 = vector.broadcast %241 : vector<1x128xi1> to vector<4x128xi1>
    %243 = vector.broadcast %cst_122 : f32 to vector<4x128xf32>
    %244 = arith.select %242, %221, %243 : vector<4x128xi1>, vector<4x128xf32>
    %c7 = arith.constant 7 : index
    %c0_123 = arith.constant 0 : index
    %c0_124 = arith.constant 0 : index
    %245 = vector.load %arg3[%c7, %c0_123, %c0_124] : memref<9x4x4xf32, #tpu.memory_space<vmem>>, vector<1x4x4xf32>
    %246 = vector.shape_cast %245 : vector<1x4x4xf32> to vector<4x4xf32>
    %cst_125 = arith.constant dense<0.000000e+00> : vector<4x128xf32>
    %247 = tpu.matmul %246, %244, %cst_125 {dimension_numbers = #tpu.dot_dimension_numbers<[1], [0], [0], [1], [0, 0, 1, 1], [], []>} : vector<4x4xf32>, vector<4x128xf32>, vector<4x128xf32> -> vector<4x128xf32>
    %248 = arith.addf %220, %247 : vector<4x128xf32>
    %c0_126 = arith.constant 0 : index
    %c18 = arith.constant 18 : index
    %249 = vector.load %arg9[%c0_126, %c18] : memref<4x146xf32, #tpu.memory_space<vmem>>, vector<4x128xf32>
    %c1_i32_127 = arith.constant 1 : i32
    %250 = vector.broadcast %c1_i32_127 : i32 to vector<1x128xi32>
    %251 = arith.addi %23, %250 : vector<1x128xi32>
    %c0_i32_128 = arith.constant 0 : i32
    %252 = vector.broadcast %c0_i32_128 : i32 to vector<1x128xi32>
    %253 = arith.cmpi sge, %251, %252 : vector<1x128xi32>
    %c1_i32_129 = arith.constant 1 : i32
    %254 = vector.broadcast %c1_i32_129 : i32 to vector<1x128xi32>
    %255 = arith.addi %23, %254 : vector<1x128xi32>
    %c8_i32_130 = arith.constant 8 : i32
    %256 = vector.broadcast %c8_i32_130 : i32 to vector<1x128xi32>
    %257 = arith.cmpi slt, %255, %256 : vector<1x128xi32>
    %258 = arith.andi %253, %257 : vector<1x128xi1>
    %c1_i32_131 = arith.constant 1 : i32
    %259 = vector.broadcast %c1_i32_131 : i32 to vector<1x128xi32>
    %260 = arith.addi %19, %259 : vector<1x128xi32>
    %c0_i32_132 = arith.constant 0 : i32
    %261 = vector.broadcast %c0_i32_132 : i32 to vector<1x128xi32>
    %262 = arith.cmpi sge, %260, %261 : vector<1x128xi32>
    %263 = arith.andi %258, %262 : vector<1x128xi1>
    %c1_i32_133 = arith.constant 1 : i32
    %264 = vector.broadcast %c1_i32_133 : i32 to vector<1x128xi32>
    %265 = arith.addi %19, %264 : vector<1x128xi32>
    %c8_i32_134 = arith.constant 8 : i32
    %266 = vector.broadcast %c8_i32_134 : i32 to vector<1x128xi32>
    %267 = arith.cmpi slt, %265, %266 : vector<1x128xi32>
    %268 = arith.andi %263, %267 : vector<1x128xi1>
    %cst_135 = arith.constant 0.000000e+00 : f32
    %269 = vector.shape_cast %268 : vector<1x128xi1> to vector<1x128xi1>
    %270 = vector.broadcast %269 : vector<1x128xi1> to vector<4x128xi1>
    %271 = vector.broadcast %cst_135 : f32 to vector<4x128xf32>
    %272 = arith.select %270, %249, %271 : vector<4x128xi1>, vector<4x128xf32>
    %c8_136 = arith.constant 8 : index
    %c0_137 = arith.constant 0 : index
    %c0_138 = arith.constant 0 : index
    %273 = vector.load %arg3[%c8_136, %c0_137, %c0_138] : memref<9x4x4xf32, #tpu.memory_space<vmem>>, vector<1x4x4xf32>
    %274 = vector.shape_cast %273 : vector<1x4x4xf32> to vector<4x4xf32>
    %cst_139 = arith.constant dense<0.000000e+00> : vector<4x128xf32>
    %275 = tpu.matmul %274, %272, %cst_139 {dimension_numbers = #tpu.dot_dimension_numbers<[1], [0], [0], [1], [0, 0, 1, 1], [], []>} : vector<4x4xf32>, vector<4x128xf32>, vector<4x128xf32> -> vector<4x128xf32>
    %276 = arith.addf %248, %275 : vector<4x128xf32>
    %c0_140 = arith.constant 0 : index
    %c0_141 = arith.constant 0 : index
    %277 = vector.load %arg4[%c0_140, %c0_141] : memref<4x1xf32, #tpu.memory_space<vmem>>, vector<4x1xf32>
    %278 = vector.broadcast %277 : vector<4x1xf32> to vector<4x128xf32>
    %279 = arith.addf %276, %278 : vector<4x128xf32>
    %cst_142 = arith.constant 0.000000e+00 : f32
    %280 = vector.broadcast %cst_142 : f32 to vector<4x128xf32>
    %281 = arith.maximumf %279, %280 : vector<4x128xf32>
    %c0_143 = arith.constant 0 : index
    %c0_144 = arith.constant 0 : index
    %282 = vector.load %arg5[%c0_143, %c0_144] : memref<16x4xf32, #tpu.memory_space<vmem>>, vector<16x4xf32>
    %cst_145 = arith.constant dense<0.000000e+00> : vector<16x128xf32>
    %283 = tpu.matmul %282, %281, %cst_145 {dimension_numbers = #tpu.dot_dimension_numbers<[1], [0], [0], [1], [0, 0, 1, 1], [], []>} : vector<16x4xf32>, vector<4x128xf32>, vector<16x128xf32> -> vector<16x128xf32>
    %c0_146 = arith.constant 0 : index
    %c0_147 = arith.constant 0 : index
    %284 = vector.load %arg6[%c0_146, %c0_147] : memref<16x1xf32, #tpu.memory_space<vmem>>, vector<16x1xf32>
    %285 = vector.broadcast %284 : vector<16x1xf32> to vector<16x128xf32>
    %286 = arith.addf %283, %285 : vector<16x128xf32>
    %287 = arith.addf %286, %6 : vector<16x128xf32>
    %cst_148 = arith.constant 0.000000e+00 : f32
    %288 = vector.broadcast %cst_148 : f32 to vector<16x128xf32>
    %289 = arith.maximumf %287, %288 : vector<16x128xf32>
    %290 = vector.extract_strided_slice %289 {offsets = [0, 0], sizes = [16, 64], strides = [1, 1]} : vector<16x128xf32> to vector<16x64xf32>
    %c0_149 = arith.constant 0 : index
    %c0_150 = arith.constant 0 : index
    %c0_151 = arith.constant 0 : index
    %291 = vector.load %arg7[%c0_149, %c0_150, %c0_151] : memref<2x16x64xf32, #tpu.memory_space<vmem>>, vector<1x16x64xf32>
    %292 = vector.shape_cast %291 : vector<1x16x64xf32> to vector<16x64xf32>
    %293 = vector.shape_cast %290 : vector<16x64xf32> to vector<1x16x64xf32>
    tpu.vector_store %arg7[%c0_149, %c0_150, %c0_151], %293 {strides = array<i32>} : memref<2x16x64xf32, #tpu.memory_space<vmem>>, vector<1x16x64xf32>,
    %294 = vector.extract_strided_slice %289 {offsets = [0, 64], sizes = [16, 64], strides = [1, 1]} : vector<16x128xf32> to vector<16x64xf32>
    %c1_152 = arith.constant 1 : index
    %c0_153 = arith.constant 0 : index
    %c0_154 = arith.constant 0 : index
    %295 = vector.load %arg7[%c1_152, %c0_153, %c0_154] : memref<2x16x64xf32, #tpu.memory_space<vmem>>, vector<1x16x64xf32>
    %296 = vector.shape_cast %295 : vector<1x16x64xf32> to vector<16x64xf32>
    %297 = vector.shape_cast %294 : vector<16x64xf32> to vector<1x16x64xf32>
    tpu.vector_store %arg7[%c1_152, %c0_153, %c0_154], %297 {strides = array<i32>} : memref<2x16x64xf32, #tpu.memory_space<vmem>>, vector<1x16x64xf32>,
    return
  }
}

</mosaic_0001>

<bundles_post_ra>
// kernel: bottleneck_forward.1
= control target key start
LH: loop header
LB: loop body
LE: loop exit
PB: predicated region body
PF: predicated region fallthrough
CT: control target
= control target key end

     0   :  { %vm28_vm0 = vcmask 523264   ;;  %v1265_v2 = vmov 0.0|0.0   ;;  %s1266_s28 = smov 64   ;;  %vm1267_vm1 = vmmov 0   ;;  %v1268_v5 = vmov 0.0   ;;  %s1272_s13 = smov 126   ;;  %s1522_s0 = inlined_call_operand.vmem [shape: f32[2,16,64], index: 0, kind: input, shape index: {}]   ;;  %s1523_s2 = inlined_call_operand.vmem [shape: f32[4,1], index: 2, kind: input, shape index: {}]   ;;  %s1524_s1 = inlined_call_operand.vmem [shape: f32[4,16], index: 1, kind: input, shape index: {}]   ;;  %s1525_s6 = inlined_call_operand.vmem [shape: f32[16,1], index: 6, kind: input, shape index: {}]   ;;  %s1526_s4 = inlined_call_operand.vmem [shape: f32[4,1], index: 4, kind: input, shape index: {}]   ;;  %s1527_s3 = inlined_call_operand.vmem [shape: f32[9,4,4], index: 3, kind: input, shape index: {}]   ;;  %s1528_s5 = inlined_call_operand.vmem [shape: f32[16,4], index: 5, kind: input, shape index: {}]   ;;  %s1529_s7 = inlined_call_operand.vmem [shape: f32[2,16,64], index: 7, kind: output, shape index: {}]  }
   0x1   :  { %v1130_v0 = vld [vmem:[%s1522_s0 + $0x10] sm:$0xff]  ;;  %v26_v1 = vld [vmem:[%s1522_s0] sm:$0xff]  ;;  %1245 = vmatprep.subr.bf16.mxu0 %v1265_v2  ;;  %v27_v3 = vld [vmem:[%s1522_s0 + $0x8] sm:$0xff]  ;;  %1192 = vmatprep.mubr.msk.f32.mxu0 %vm1267_vm1, %v1268_v5  ;;  %v1269_v6 = vmov 0   ;;  %vm42_vm2 = vcmask 1048064   ;;  %vm54_vm3 = vcmask 130048   ;;  %v144_v27 = vlaneseq }
   0x2   :  { %36 = vrot.lane.b32.xlu0 %v1130_v0, %s1266_s28  ;;  %29 = vst.msk [vmem:[#allocation2] sm:$0xff] %vm28_vm0, %v26_v1  ;;  %v1131_v4 = vld [vmem:[%s1522_s0 + $0x18] sm:$0xff]  ;;  %30 = vst.msk [vmem:[#allocation2 + $0x8] sm:$0xff] %vm28_vm0, %v27_v3  ;;  %1195 = vmatprep.subr.mxu1 %v1268_v5  ;;  %v48_v7 = vld [vmem:[%s1523_s2] sm:$0xf]  ;;  %vm129_vm4 = vcmask 1043456  }
   0x3   :  { %1197 = vmatprep.mubr.msk.f32.mxu1 %vm1267_vm1, %v1268_v5  ;;  %1262 = vset.pattern.permute.xlu1 %v1269_v6  ;;  %v47_v13 = vld [vmem:[%s1524_s1] sm:$0xf]  ;;  %vm130_vm5 = vcmask 146436   ;;  %s1270_s2 = smov 9   ;;  %vm140_vm7 = vcmask 1043528   ;;  %vm141_vm8 = vcmask 72708  }
   0x4   :  { %1263 = vset.pattern.permute.xlu0 %v1269_v6  ;;  %51 = vperm.xlu1 %1262, %v48_v7   ;;  %vm131_vm6 = vmor %vm130_vm5, %vm129_vm4  ;;  %vm137_vm9 = vcmask 72704   ;;  %s1271_s1 = smov 127   ;;  %s1273_s14 = smov 120   ;;  %v1013_v24 = vld [vmem:[%s1525_s6] sm:$0xff]  ;;  %v1014_v25 = vld [vmem:[%s1525_s6 + $0x8] sm:$0xff]  ;;  %v145_v28 = vand.u32 127, %v144_v27 }
   0x5   :  { %132 = vst.msk [vmem:[#allocation3] sm:$0xff] %vm131_vm6, %v1268_v5  ;;  %vm142_vm10 = vmor %vm141_vm8, %vm140_vm7  ;;  %s1274_s15 = smov 119   ;;  %s1275_s16 = smov 118   ;;  %v1003_v26 = vld [vmem:[%s1526_s4] sm:$0xf]  ;;  %vm176_vm13 = vcmask 1039360  }
   0x6   :  { %38 = vrot.lane.b32.xlu0 %v1131_v4, %s1266_s28  ;;  %s1276_s17 = smov 112   ;;  %s1277_s18 = smov 111   ;;  %v147_v29 = vshra.s32 %v145_v28, 3  ;;  %v146_v31 = vand.u32 7, %v145_v28  ;;  %v1133_v38 = vld [vmem:[%s1527_s3 + $0x4] sm:$0xf] }
   0x7   :  { %s1278_s19 = smov 110   ;;  %vm182_vm5 = vcmask 31744   ;;  %vm349_vm8 = vcmask 1031168   ;;  %v162_v49 = vld [vmem:[%s1527_s3] sm:$0xf] }
   0x8   :  { %v148_v30 = vand.u32 7, %v147_v29  ;;  %v1366_v33 = vadd.s32 4294967295, %v146_v31  ;;  %v1368_v34 = vadd.s32 1, %v146_v31  ;;  %v1138_v52 = vld [vmem:[%s1527_s3 + $0x8] sm:$0xf] }
   0x9   :  { %v1141_v55 = vld [vmem:[%s1527_s3 + $0xc] sm:$0xf]  ;;  %v1144_v61 = vld [vmem:[%s1527_s3 + $0x10] sm:$0xf]  ;;  %v1147_v3 = vld [vmem:[%s1527_s3 + $0x14] sm:$0xf] }
   0xa   :  { %v150_v32 = vadd.s32 4294967295, %v148_v30  ;;  %vm155_vm15 = vcmp.ge.s32.totalorder %v1366_v33, 0  ;;  %vm433_vm6 = vcmp.ge.s32.totalorder %v148_v30, 0  ;;  %vm434_vm7 = vcmp.lt.s32.totalorder %v148_v30, 8 }
   0xb   :  { %v718_v56 = vadd.s32 1, %v148_v30 }
   0xc   :  { %vm151_vm11 = vcmp.ge.s32.totalorder %v150_v32, 0  ;;  %vm152_vm12 = vcmp.lt.s32.totalorder %v150_v32, 8 }
   0xd   :  { %vm1370_vm14 = vmand %vm151_vm11, %vm152_vm12  ;;  %vm446_vm11 = vcmask 982016  }
  0x74   :  { %v37_v8 = vpop.permute.xlu0 %36 }
  0x75   :  { %43 = vst.msk [vmem:[#allocation2] sm:$0xff] %vm42_vm2, %v37_v8 }
  0x78   :  { %v39_v9 = vpop.permute.xlu0 %38 }
  0x79   :  { %44 = vst.msk [vmem:[#allocation2 + $0x8] sm:$0xff] %vm42_vm2, %v39_v9  ;;  %vm339_vm2 = vcmp.lt.s32.totalorder %v1368_v34, 8  ;;  %v1150_v9 = vld [vmem:[%s1527_s3 + $0x18] sm:$0xf] }
  0x7c   :  { %v1343_v10 = vld [vmem:[#allocation2] sm:$0xff] }
  0x80   :  { %v1345_v11 = vld [vmem:[#allocation2 + $0x8] sm:$0xff] }
  0x81   :  { %v1246_v12 = vpack.c.bf16 %v1345_v11, %v1343_v10 }
  0x83   :  { %1247 = vmatpush3.bf16.msra.mxu0 %v1246_v12  ;;  %v52_v14 = vpop.permute.xlu1 %51 }
  0x84   :  { %1205 = vmatprep.subr.mxu0 %v1268_v5 }
  0x86   :  { %1193 = vmatmul.mubr.msk.f32.vlgmr.msra.gmra.mrb[0].mxu0 %vm54_vm3, %v47_v13  ;;  %vm1383_vm3 = vmand %vm1370_vm14, %vm155_vm15 }
  0x87   :  { %1207 = vmatprep.mubr.msk.f32.mxu0 %vm1267_vm1, %v1268_v5 }
 0x159   :  { %v124_v15 = vpop.f32.mrb[0].mxu0 }
 0x15a   :  { %v125_v16 = vadd.f32 %v124_v15, %v52_v14  ;;  %v1194_v17 = vpop.f32.mrb[1].mxu0 }
 0x15c   :  { %v128_v18 = vmax.f32 %v125_v16, 0.0  ;;  %v1153_v16 = vld [vmem:[%s1527_s3 + $0x1c] sm:$0xf] }
 0x15e   :  { %134 = vrot.lane.b32.xlu1 %v128_v18, %s1270_s2 }
 0x1d0   :  { %v135_v19 = vpop.permute.xlu1 %134 }
 0x1d1   :  { %v136_v20 = vrot.slane %v135_v19, 4 }
 0x1d3   :  { %v138_v21 = vsel %vm137_vm9, %v136_v20, %v135_v19  ;;  %vm1394_vm9 = vmand %vm1370_vm14, %vm339_vm2 }
 0x1d4   :  { %143 = vst.msk [vmem:[#allocation3] sm:$0xff] %vm142_vm10, %v138_v21  ;;  %vm1402_vm10 = vmand %vm433_vm6, %vm434_vm7  ;;  %vm634_vm6 = vcmask 965632  }
 0x1d5   :  { %vm436_vm12 = vmand %vm1402_vm10, %vm155_vm15 }
 0x1d6   :  { %vm625_vm7 = vmand %vm1402_vm10, %vm339_vm2 }
 0x1db   :  { %v163_v22 = vld [vmem:[#allocation3] sm:$0xff] }
 0x1dc   :  { %172 = vrot.lane.b32.xlu0 %v163_v22, %s1271_s1  ;;  %v171_v23 = vcombine.high %v163_v22, %v163_v22  ;;  %v149_v41 = vld [vmem:[#allocation3] sm:$0xf] }
 0x1dd   :  { %v161_v46 = vsel %vm1383_vm3, %v149_v41, 0.0  ;;  %vm720_vm3 = vcmp.lt.s32.totalorder %v718_v56, 8 }
 0x1de   :  { %174 = vrot.lane.b32.xlu1 %v171_v23, %s1271_s1 }
 0x1e0   :  { %345 = vrot.lane.b32.xlu0 %v163_v22, %s1272_s13 }
 0x1e2   :  { %347 = vrot.lane.b32.xlu1 %v171_v23, %s1272_s13 }
 0x1e4   :  { %442 = vrot.lane.b32.xlu0 %v163_v22, %s1273_s14 }
 0x1e6   :  { %444 = vrot.lane.b32.xlu1 %v171_v23, %s1273_s14 }
 0x1e8   :  { %536 = vrot.lane.b32.xlu0 %v163_v22, %s1274_s15 }
 0x1ea   :  { %538 = vrot.lane.b32.xlu1 %v171_v23, %s1274_s15 }
 0x1ec   :  { %630 = vrot.lane.b32.xlu0 %v163_v22, %s1275_s16 }
 0x1ee   :  { %632 = vrot.lane.b32.xlu1 %v171_v23, %s1275_s16 }
 0x1f0   :  { %728 = vrot.lane.b32.xlu0 %v163_v22, %s1276_s17 }
 0x1f2   :  { %730 = vrot.lane.b32.xlu1 %v171_v23, %s1276_s17 }
 0x1f4   :  { %822 = vrot.lane.b32.xlu0 %v163_v22, %s1277_s18 }
 0x1f6   :  { %824 = vrot.lane.b32.xlu1 %v171_v23, %s1277_s18 }
 0x1f8   :  { %916 = vrot.lane.b32.xlu0 %v163_v22, %s1278_s19  ;;  %v1011_v22 = vld [vmem:[%s1528_s5] sm:$0xff] }
 0x1fa   :  { %918 = vrot.lane.b32.xlu1 %v171_v23, %s1278_s19 }
 0x1fc   :  { %1006 = vperm.xlu0 %1263, %v1003_v26  }
 0x1fe   :  { %1017 = vperm.xlu1 %1262, %v1013_v24  }
 0x202   :  { %1022 = vperm.xlu1 %1262, %v1014_v25  }
 0x24e   :  { %v173_v35 = vpop.permute.xlu0 %172 }
 0x250   :  { %v175_v37 = vpop.permute.xlu1 %174 }
 0x251   :  { %v177_v39 = vsel %vm176_vm13, %v173_v35, %v175_v37  ;;  %vm540_vm13 = vcmask 973824  }
 0x252   :  { %v346_v42 = vpop.permute.xlu0 %345  ;;  %v179_v43 = vsel %vm1370_vm14, %v177_v39, 0.0  ;;  %vm719_vm14 = vcmp.ge.s32.totalorder %v718_v56, 0 }
 0x253   :  { %1196 = vmatpush3.msk.msra.mxu1 %vm129_vm4, %v179_v43 }
 0x254   :  { %1200 = vmatprep.subr.mxu1 %v1268_v5  ;;  %v348_v45 = vpop.permute.xlu1 %347  ;;  %1198 = vmatmul.mubr.msk.f32.vlgmr.msra.gmra.mrb[0].mxu1 %vm182_vm5, %v1133_v38 }
 0x255   :  { %v350_v48 = vsel %vm349_vm8, %v346_v42, %v348_v45  ;;  %1201 = vmatpush3.msk.msra.mxu1 %vm129_vm4, %v161_v46  ;;  %1202 = vmatprep.mubr.msk.f32.mxu1 %vm1267_vm1, %v1268_v5  ;;  %vm1449_vm8 = vmand %vm719_vm14, %vm720_vm3 }
 0x256   :  { %v352_v50 = vsel %vm1394_vm9, %v350_v48, 0.0  ;;  %v443_v51 = vpop.permute.xlu0 %442  ;;  %1210 = vmatprep.subr.mxu1 %v1268_v5  ;;  %vm732_vm9 = vcmask 916480  }
 0x257   :  { %1206 = vmatpush3.msk.msra.mxu0 %vm129_vm4, %v352_v50 }
 0x258   :  { %v445_v53 = vpop.permute.xlu1 %444  ;;  %1203 = vmatmul.mubr.msk.f32.vlgmr.msra.gmra.mrb[2].mxu1 %vm182_vm5, %v162_v49  ;;  %1215 = vmatprep.subr.mxu0 %v1268_v5 }
 0x259   :  { %v447_v54 = vsel %vm446_vm11, %v443_v51, %v445_v53  ;;  %1208 = vmatmul.mubr.msk.f32.vlgmr.msra.gmra.mrb[2].mxu0 %vm182_vm5, %v1138_v52  ;;  %1212 = vmatprep.mubr.msk.f32.mxu1 %vm1267_vm1, %v1268_v5  ;;  %vm826_vm11 = vcmask 908288   ;;  %v1012_v52 = vld [vmem:[%s1528_s5 + $0x8] sm:$0xff] }
 0x25a   :  { %v449_v57 = vsel %vm436_vm12, %v447_v54, 0.0  ;;  %v537_v58 = vpop.permute.xlu0 %536  ;;  %1217 = vmatprep.mubr.msk.f32.mxu0 %vm1267_vm1, %v1268_v5  ;;  %vm911_vm12 = vmand %vm1449_vm8, %vm339_vm2 }
 0x25b   :  { %1211 = vmatpush3.msk.msra.mxu1 %vm129_vm4, %v449_v57 }
 0x25c   :  { %v539_v59 = vpop.permute.xlu1 %538  ;;  %1213 = vmatmul.mubr.msk.f32.vlgmr.msra.gmra.mrb[4].mxu1 %vm182_vm5, %v1141_v55  ;;  %1220 = vmatprep.subr.mxu1 %v1268_v5 }
 0x25d   :  { %v541_v60 = vsel %vm540_vm13, %v537_v58, %v539_v59  ;;  %1222 = vmatprep.mubr.msk.f32.mxu1 %vm1267_vm1, %v1268_v5 }
 0x25e   :  { %v543_v62 = vsel %vm1402_vm10, %v541_v60, 0.0  ;;  %v631_v63 = vpop.permute.xlu0 %630  ;;  %vm722_vm10 = vmand %vm1449_vm8, %vm155_vm15  ;;  %vm920_vm15 = vcmask 900096  }
 0x25f   :  { %1216 = vmatpush3.msk.msra.mxu0 %vm129_vm4, %v543_v62 }
 0x260   :  { %v633_v0 = vpop.permute.xlu1 %632  ;;  %1218 = vmatmul.mubr.msk.f32.vlgmr.msra.gmra.mrb[4].mxu0 %vm182_vm5, %v1144_v61  ;;  %1225 = vmatprep.subr.mxu0 %v1268_v5 }
 0x261   :  { %v635_v2 = vsel %vm634_vm6, %v631_v63, %v633_v0  ;;  %1227 = vmatprep.mubr.msk.f32.mxu0 %vm1267_vm1, %v1268_v5 }
 0x262   :  { %v637_v4 = vsel %vm625_vm7, %v635_v2, 0.0  ;;  %v729_v6 = vpop.permute.xlu0 %728 }
 0x263   :  { %1221 = vmatpush3.msk.msra.mxu1 %vm129_vm4, %v637_v4 }
 0x264   :  { %v731_v7 = vpop.permute.xlu1 %730  ;;  %1223 = vmatmul.mubr.msk.f32.vlgmr.msra.gmra.mrb[6].mxu1 %vm182_vm5, %v1147_v3  ;;  %1230 = vmatprep.subr.mxu1 %v1268_v5 }
 0x265   :  { %v733_v8 = vsel %vm732_vm9, %v729_v6, %v731_v7  ;;  %1232 = vmatprep.mubr.msk.f32.mxu1 %vm1267_vm1, %v1268_v5 }
 0x266   :  { %v735_v12 = vsel %vm722_vm10, %v733_v8, 0.0  ;;  %v823_v13 = vpop.permute.xlu0 %822 }
 0x267   :  { %1226 = vmatpush3.msk.msra.mxu0 %vm129_vm4, %v735_v12 }
 0x268   :  { %1228 = vmatmul.mubr.msk.f32.vlgmr.msra.gmra.mrb[6].mxu0 %vm182_vm5, %v1150_v9  ;;  %v825_v14 = vpop.permute.xlu1 %824  ;;  %1235 = vmatprep.subr.mxu0 %v1268_v5 }
 0x269   :  { %v827_v15 = vsel %vm826_vm11, %v823_v13, %v825_v14  ;;  %1237 = vmatprep.mubr.msk.f32.mxu0 %vm1267_vm1, %v1268_v5  ;;  %v1156_v5 = vld [vmem:[%s1527_s3 + $0x20] sm:$0xf] }
 0x26a   :  { %v829_v17 = vsel %vm1449_vm8, %v827_v15, 0.0  ;;  %v917_v18 = vpop.permute.xlu0 %916 }
 0x26b   :  { %1231 = vmatpush3.msk.msra.mxu1 %vm129_vm4, %v829_v17 }
 0x26c   :  { %v919_v19 = vpop.permute.xlu1 %918  ;;  %1233 = vmatmul.mubr.msk.f32.vlgmr.msra.gmra.mrb[8].mxu1 %vm182_vm5, %v1153_v16 }
 0x26d   :  { %v921_v20 = vsel %vm920_vm15, %v917_v18, %v919_v19  ;;  %1242 = vmatprep.mubr.msk.f32.mxu1 %vm182_vm5, %v1011_v22 }
 0x26e   :  { %v923_v21 = vsel %vm911_vm12, %v921_v20, 0.0 }
 0x26f   :  { %1236 = vmatpush3.msk.msra.mxu0 %vm129_vm4, %v923_v21 }
 0x270   :  { %1238 = vmatmul.mubr.msk.f32.vlgmr.msra.gmra.mrb[8].mxu0 %vm182_vm5, %v1156_v5 }
 0x27b   :  { %v1007_v47 = vpop.permute.xlu0 %1006 }
 0x27d   :  { %v1018_v53 = vpop.permute.xlu1 %1017 }
 0x281   :  { %v1023_v54 = vpop.permute.xlu1 %1022 }
 0x327   :  { %v255_v23 = vpop.f32.mrb[0].mxu1 }
 0x328   :  { %v1199_v24 = vpop.f32.mrb[1].mxu1 }
 0x32b   :  { %v331_v25 = vpop.f32.mrb[2].mxu1 }
 0x32c   :  { %v332_v26 = vadd.f32 %v331_v25, %v255_v23  ;;  %v427_v27 = vpop.f32.mrb[2].mxu0  ;;  %v1204_v28 = vpop.f32.mrb[3].mxu1 }
 0x32d   :  { %v1209_v29 = vpop.f32.mrb[3].mxu0 }
 0x32e   :  { %v431_v30 = vadd.f32 %v427_v27, %v332_v26 }
 0x32f   :  { %v524_v31 = vpop.f32.mrb[4].mxu1 }
 0x330   :  { %v528_v32 = vadd.f32 %v524_v31, %v431_v30  ;;  %v1214_v33 = vpop.f32.mrb[5].mxu1 }
 0x333   :  { %v618_v34 = vpop.f32.mrb[4].mxu0 }
 0x334   :  { %v622_v35 = vadd.f32 %v618_v34, %v528_v32  ;;  %v1219_v36 = vpop.f32.mrb[5].mxu0 }
 0x337   :  { %v712_v37 = vpop.f32.mrb[6].mxu1 }
 0x338   :  { %v716_v38 = vadd.f32 %v712_v37, %v622_v35  ;;  %v1224_v39 = vpop.f32.mrb[7].mxu1 }
 0x33b   :  { %v810_v40 = vpop.f32.mrb[6].mxu0 }
 0x33c   :  { %v814_v41 = vadd.f32 %v810_v40, %v716_v38  ;;  %v1229_v42 = vpop.f32.mrb[7].mxu0 }
 0x33f   :  { %v904_v43 = vpop.f32.mrb[8].mxu1 }
 0x340   :  { %v908_v44 = vadd.f32 %v904_v43, %v814_v41  ;;  %v1234_v45 = vpop.f32.mrb[9].mxu1 }
 0x343   :  { %v998_v46 = vpop.f32.mrb[8].mxu0 }
 0x344   :  { %v1002_v48 = vadd.f32 %v998_v46, %v908_v44  ;;  %v1239_v49 = vpop.f32.mrb[9].mxu0 }
 0x346   :  { %v1009_v50 = vadd.f32 %v1007_v47, %v1002_v48 }
 0x348   :  { %v1010_v51 = vmax.f32 %v1009_v50, 0.0 }
 0x34a   :  { %1240 = vmatprep.subr.msk.mxu1 %vm129_vm4, %v1010_v51 }
 0x34b   :  { %1241 = vmatpush3.msk.msra.mxu1 %vm129_vm4, %v1010_v51 }
 0x34c   :  { %1243 = vmatmul.mubr.msk.f32.vlgmr.msra.gmra.mrb[10].mxu1 %vm182_vm5, %v1012_v52 }
 0x41f   :  { %v1244_v55 = vpop.f32.mrb[10].mxu1 }
 0x420   :  { %v1106_v56 = vadd.f32 %v1244_v55, %v1023_v54  ;;  %v1100_v57 = vpop.f32.mrb[11].mxu1 }
 0x421   :  { %v1101_v58 = vadd.f32 %v1100_v57, %v1018_v53 }
 0x422   :  { %v1110_v59 = vadd.f32 %v1106_v56, %v1345_v11 }
 0x423   :  { %v1109_v60 = vadd.f32 %v1101_v58, %v1343_v10 }
 0x424   :  { %v1112_v61 = vmax.f32 %v1110_v59, 0.0 }
 0x425   :  { %v1111_v62 = vmax.f32 %v1109_v60, 0.0 }
 0x426   :  { %1119 = vrot.lane.b32.xlu1 %v1112_v61, %s1266_s28  ;;  %1114 = vst.msk [vmem:[%s1529_s7 + $0x8] sm:$0xff] %vm28_vm0, %v1112_v61 }
 0x427   :  { %1117 = vrot.lane.b32.xlu0 %v1111_v62, %s1266_s28  ;;  %1113 = vst.msk [vmem:[%s1529_s7] sm:$0xff] %vm28_vm0, %v1111_v62 }
 0x498   :  { %v1120_v63 = vpop.permute.xlu1 %1119 }
 0x499   :  { %1163 = vst.msk [vmem:[%s1529_s7 + $0x18] sm:$0xff] %vm28_vm0, %v1120_v63  ;;  %v1118_v10 = vpop.permute.xlu0 %1117 }
 0x49a   :  { %1162 = vst.msk [vmem:[%s1529_s7 + $0x10] sm:$0xff] %vm28_vm0, %v1118_v10 }

</bundles_post_ra>
